<compile_context>
chip_gen: v6e
topology: v6e:2x2x1
jax: 0.10.0
libtpu: 0.0.40
codegen_flags: <defaults>
</compile_context>

<pallas_src>
import functools

import jax
import jax.numpy as jnp
from jax.experimental import pallas as pl
from jax.experimental.pallas import tpu as pltpu


def _fused_linear_relu_kernel(x_ref, w_ref, b_ref, o_ref, acc_ref, *, use_bf16):
    """Computes one (tm, tn) output tile, accumulating over the K grid axis.

    x_ref  : (tm, tk)  input rows
    w_ref  : (tn, tk)  weight rows in native (N, K) layout (no transpose)
    b_ref  : (1, tn)   bias tile (block index constant across k -> no per-step DMA)
    o_ref  : (tm, tn)  output tile (resident across the k axis)
    acc_ref: (tm, tn)  f32 accumulator scratch
    """
    k = pl.program_id(2)

    @pl.when(k == 0)
    def _init():
        acc_ref[...] = jnp.zeros_like(acc_ref)

    lhs = x_ref[...]
    rhs = w_ref[...]
    if use_bf16:
        # Opt-in throughput mode (v6e/v7x): bf16 inputs, f32 accumulation.
        lhs = lhs.astype(jnp.bfloat16)
        rhs = rhs.astype(jnp.bfloat16)

    # (tm, tk) x (tn, tk) contracted on K -> (tm, tn) on the MXU, f32 acc.
    acc_ref[...] += jax.lax.dot_general(
        lhs,
        rhs,
        dimension_numbers=(((1,), (1,)), ((), ())),
        preferred_element_type=jnp.float32,
    )

    @pl.when(k == pl.num_programs(2) - 1)
    def _finish():
        # Fused bias add + ReLU (clamp_min(.., 0)) on the VPU.
        o_ref[...] = jnp.maximum(acc_ref[...] + b_ref[...], 0.0).astype(o_ref.dtype)


def _pick_tiles(B, K, N, tm, tn, tk):
    """Tile selection: big, (8,128)-aligned tiles; weight read once when possible."""
    if tm is None:
        # tm = B (single batch panel) => weight matrix streams from HBM exactly
        # once. Cap at 512 to bound the VMEM footprint.
        tm = B if B <= 512 else 512
    if tn is None:
        tn = N if N <= 512 else 512
        # v7x megacore: if the B axis collapses to one block, keep >= 2 blocks
        # along the "parallel" N axis so both TensorCores get work.
        if B <= tm and N >= 256 and pl.cdiv(N, tn) == 1:
            tn = max(128, ((N // 2) // 128) * 128)
    if tk is None:
        cap = 2048
        if K <= cap:
            tk = K
        else:
            # Pick the largest multiple of 128 <= cap that divides K so the
            # reduction axis never includes padded (garbage) elements.
            tk = K  # fallback: full-K block (always correct)
            for cand in range(cap, 127, -128):
                if K % cand == 0:
                    tk = cand
                    break
    return tm, tn, tk


@functools.partial(jax.jit, static_argnames=("tm", "tn", "tk", "use_bf16"))
def fused_linear_relu(x, weight, bias, *, tm=None, tn=None, tk=None, use_bf16=False):
    """relu(x @ weight.T + bias), matching the PyTorch FusedLinearReLU forward."""
    B, K = x.shape
    N, K2 = weight.shape
    assert K == K2, "in_features mismatch"

    tm, tn, tk = _pick_tiles(B, K, N, tm, tn, tk)

    # Bias lifted to 2D for lane-major broadcasting (tiny; no transpose of any
    # large operand happens in the wrapper).
    b2 = bias.reshape(1, N)

    grid = (pl.cdiv(B, tm), pl.cdiv(N, tn), pl.cdiv(K, tk))

    # Per-step VMEM footprint: double-buffered x/w/out/bias tiles + accumulator.
    # Set an explicit scoped-VMEM limit (v5e default is only 16 MiB; keep well
    # under v7x's 64 MiB physical).
    est_bytes = 4 * (2 * (tm * tk + tn * tk + tm * tn + tn) + tm * tn)
    vmem_limit = int(min(max(est_bytes + (8 << 20), 32 << 20), 56 << 20))

    cost = pl.CostEstimate(
        flops=2 * B * N * K,
        bytes_accessed=4 * (B * K + N * K + B * N + N),
        transcendentals=0,
    )

    kernel = functools.partial(_fused_linear_relu_kernel, use_bf16=use_bf16)

    return pl.pallas_call(
        kernel,
        out_shape=jax.ShapeDtypeStruct((B, N), x.dtype),
        grid_spec=pltpu.PrefetchScalarGridSpec(
            num_scalar_prefetch=0,
            grid=grid,
            in_specs=[
                pl.BlockSpec((tm, tk), lambda i, j, k: (i, k)),  # x: row/K tile
                pl.BlockSpec((tn, tk), lambda i, j, k: (j, k)),  # weight: native (N, K)
                pl.BlockSpec((1, tn), lambda i, j, k: (0, j)),   # bias: const across k
            ],
            out_specs=pl.BlockSpec((tm, tn), lambda i, j, k: (i, j)),
            scratch_shapes=[pltpu.VMEM((tm, tn), jnp.float32)],
        ),
        compiler_params=pltpu.CompilerParams(
            dimension_semantics=("parallel", "parallel", "arbitrary"),
            vmem_limit_bytes=vmem_limit,
        ),
        cost_estimate=cost,
    )(x, weight, b2)


if __name__ == "__main__":
    # Deterministic parameter + input construction (synthetic, no checkpoint).
    in_features, out_features = 32, 64
    batch = 8

    key = jax.random.PRNGKey(0)
    k_x, k_w = jax.random.split(key)

    x = jax.random.normal(k_x, (batch, in_features), dtype=jnp.float32)
    weight = jax.random.normal(k_w, (out_features, in_features), dtype=jnp.float32)
    bias = jnp.zeros((out_features,), dtype=jnp.float32)  # matches torch.zeros init

    out = jax.block_until_ready(fused_linear_relu(x, weight, bias))

    # Sanity check against plain-JAX reference (same math as the C++ extension).
    ref = jnp.maximum(x @ weight.T + bias, 0.0)
    assert out.shape == (batch, out_features)
    assert jnp.allclose(out, ref, atol=1e-5, rtol=1e-5), "mismatch vs reference"

    print("KERNEL_OK")
</pallas_src>

<mosaic_0001>
module attributes {stable_mosaic.version = 11 : i64} {
  func.func @_fused_linear_relu_kernel(%arg0: i32, %arg1: i32, %arg2: i32, %arg3: memref<8x32xf32, #tpu.memory_space<vmem>>, %arg4: memref<64x32xf32, #tpu.memory_space<vmem>>, %arg5: memref<1x64xf32, #tpu.memory_space<vmem>>, %arg6: memref<8x64xf32, #tpu.memory_space<vmem>>, %arg7: memref<8x64xf32, #tpu.memory_space<vmem>>) attributes {dimension_semantics = [#tpu.dimension_semantics<parallel>, #tpu.dimension_semantics<parallel>, #tpu.dimension_semantics<arbitrary>], iteration_bounds = array<i64: 1, 1, 1>, scalar_prefetch = 0 : i64, scratch_operands = 1 : i64, tpu.core_type = #tpu.core_type<tc>, window_params = [{transform_indices = @transform_0, window_bounds = array<i64: 8, 32>}, {transform_indices = @transform_1, window_bounds = array<i64: 64, 32>}, {transform_indices = @transform_2, window_bounds = array<i64: 1, 64>}, {transform_indices = @transform_3, window_bounds = array<i64: 8, 64>}]} {
    %c0_i32 = arith.constant 0 : i32
    %0 = arith.cmpi eq, %arg2, %c0_i32 : i32
    %1 = arith.extui %0 : i1 to i32
    %c0_i32_0 = arith.constant 0 : i32
    %2 = arith.cmpi ne, %1, %c0_i32_0 : i32
    scf.if %2 {
      %cst_10 = arith.constant 0.000000e+00 : f32
      %12 = vector.broadcast %cst_10 : f32 to vector<8x64xf32>
      %c0_11 = arith.constant 0 : index
      %c0_12 = arith.constant 0 : index
      %13 = vector.load %arg7[%c0_11, %c0_12] : memref<8x64xf32, #tpu.memory_space<vmem>>, vector<8x64xf32>
      tpu.vector_store %arg7[%c0_11, %c0_12], %12 {strides = array<i32>} : memref<8x64xf32, #tpu.memory_space<vmem>>, vector<8x64xf32>,
    } else {
    }
    %c0 = arith.constant 0 : index
    %c0_1 = arith.constant 0 : index
    %3 = vector.load %arg3[%c0, %c0_1] : memref<8x32xf32, #tpu.memory_space<vmem>>, vector<8x32xf32>
    %c0_2 = arith.constant 0 : index
    %c0_3 = arith.constant 0 : index
    %4 = vector.load %arg4[%c0_2, %c0_3] : memref<64x32xf32, #tpu.memory_space<vmem>>, vector<64x32xf32>
    %c0_4 = arith.constant 0 : index
    %c0_5 = arith.constant 0 : index
    %5 = vector.load %arg7[%c0_4, %c0_5] : memref<8x64xf32, #tpu.memory_space<vmem>>, vector<8x64xf32>
    %cst = arith.constant dense<0.000000e+00> : vector<8x64xf32>
    %6 = tpu.matmul %3, %4, %cst {dimension_numbers = #tpu.dot_dimension_numbers<[1], [1], [0], [0], [0, 0, 1, 0], [], []>} : vector<8x32xf32>, vector<64x32xf32>, vector<8x64xf32> -> vector<8x64xf32>
    %7 = arith.addf %5, %6 : vector<8x64xf32>
    %c0_6 = arith.constant 0 : index
    %c0_7 = arith.constant 0 : index
    %8 = vector.load %arg7[%c0_6, %c0_7] : memref<8x64xf32, #tpu.memory_space<vmem>>, vector<8x64xf32>
    tpu.vector_store %arg7[%c0_6, %c0_7], %7 {strides = array<i32>} : memref<8x64xf32, #tpu.memory_space<vmem>>, vector<8x64xf32>,
    %c0_i32_8 = arith.constant 0 : i32
    %9 = arith.cmpi eq, %arg2, %c0_i32_8 : i32
    %10 = arith.extui %9 : i1 to i32
    %c0_i32_9 = arith.constant 0 : i32
    %11 = arith.cmpi ne, %10, %c0_i32_9 : i32
    scf.if %11 {
      %c0_10 = arith.constant 0 : index
      %c0_11 = arith.constant 0 : index
      %12 = vector.load %arg7[%c0_10, %c0_11] : memref<8x64xf32, #tpu.memory_space<vmem>>, vector<8x64xf32>
      %c0_12 = arith.constant 0 : index
      %c0_13 = arith.constant 0 : index
      %13 = vector.load %arg5[%c0_12, %c0_13] : memref<1x64xf32, #tpu.memory_space<vmem>>, vector<1x64xf32>
      %14 = vector.broadcast %13 : vector<1x64xf32> to vector<8x64xf32>
      %15 = arith.addf %12, %14 : vector<8x64xf32>
      %cst_14 = arith.constant 0.000000e+00 : f32
      %16 = vector.broadcast %cst_14 : f32 to vector<8x64xf32>
      %17 = arith.maximumf %15, %16 : vector<8x64xf32>
      %c0_15 = arith.constant 0 : index
      %c0_16 = arith.constant 0 : index
      %18 = vector.load %arg6[%c0_15, %c0_16] : memref<8x64xf32, #tpu.memory_space<vmem>>, vector<8x64xf32>
      tpu.vector_store %arg6[%c0_15, %c0_16], %17 {strides = array<i32>} : memref<8x64xf32, #tpu.memory_space<vmem>>, vector<8x64xf32>,
    } else {
    }
    return
  }
  func.func @transform_0(%arg0: i32, %arg1: i32, %arg2: i32) -> (i32, i32) {
    %c0_i32 = arith.constant 0 : i32
    return %arg0, %arg2 : i32, i32
  }
  func.func @transform_1(%arg0: i32, %arg1: i32, %arg2: i32) -> (i32, i32) {
    %c0_i32 = arith.constant 0 : i32
    return %arg1, %arg2 : i32, i32
  }
  func.func @transform_2(%arg0: i32, %arg1: i32, %arg2: i32) -> (i32, i32) {
    %c0_i32 = arith.constant 0 : i32
    %c0_i32_0 = arith.constant 0 : i32
    return %c0_i32, %arg1 : i32, i32
  }
  func.func @transform_3(%arg0: i32, %arg1: i32, %arg2: i32) -> (i32, i32) {
    %c0_i32 = arith.constant 0 : i32
    return %arg0, %arg1 : i32, i32
  }
}

</mosaic_0001>

<bundles_post_ra>
// kernel: fused_linear_relu.1
= control target key start
LH: loop header
LB: loop body
LE: loop exit
PB: predicated region body
PF: predicated region fallthrough
CT: control target
= control target key end

     0   :  { %vm31_vm0 = vcmask 261120   ;;  %v223_v1 = vmov 0.0   ;;  %vm224_vm1 = vmmov 0   ;;  %vm19_vm2 = vcmask 523264   ;;  %s291_s0 = inlined_call_operand.vmem [shape: f32[8,32], index: 0, kind: input, shape index: {}]   ;;  %s292_s1 = inlined_call_operand.vmem [shape: f32[64,32], index: 1, kind: input, shape index: {}]   ;;  %s293_s2 = inlined_call_operand.vmem [shape: f32[1,64], index: 2, kind: input, shape index: {}]   ;;  %s294_s3 = inlined_call_operand.hbm [shape: f32[8,64], index: 3, kind: output, shape index: {}]  }
   0x1   :  { %v29_v0 = vld [vmem:[%s292_s1 + $0x38] sm:$0xff]  ;;  %179 = vmatprep.subr.mxu0 %v223_v1  ;;  %195 = vmatprep.mubr.msk.f32.mxu0 %vm224_vm1, %v223_v1  ;;  %20 = vst.msk [vmem:[#allocation2] sm:$0xff] %vm19_vm2, %v223_v1  ;;  %v28_v2 = vld [vmem:[%s292_s1 + $0x30] sm:$0xff] }
   0x2   :  { %180 = vmatpush3.xpose.msk.msra.mxu0 %vm31_vm0, %v29_v0 }
   0x3   :  { %181 = vmatprep.subr.mxu0 %v223_v1 }
   0x4   :  { %8 = vsyncpa [#allocation4], 0  ;;  %v27_v3 = vld [vmem:[%s292_s1 + $0x28] sm:$0xff]  ;;  %v26_v4 = vld [vmem:[%s292_s1 + $0x20] sm:$0xff] }
   0x5   :  { %v25_v5 = vld [vmem:[%s292_s1 + $0x18] sm:$0xff]  ;;  %v24_v6 = vld [vmem:[%s292_s1 + $0x10] sm:$0xff]  ;;  %v23_v7 = vld [vmem:[%s292_s1 + $0x8] sm:$0xff] }
   0x6   :  { %182 = vmatpush3.xpose.msk.msra.mxu0 %vm31_vm0, %v28_v2  ;;  %v22_v8 = vld [vmem:[%s292_s1] sm:$0xff]  ;;  %s225_s1 = smov [#allocation3]  }
   0x7   :  { %183 = vmatprep.subr.mxu0 %v223_v1  ;;  %v21_v9 = vld [vmem:[%s291_s0] sm:$0xff]  ;;  %s152_s5 = sshll.u32 %s225_s1, 4  ;;  %s153_s5 = int_to_ptr.vmem [resolvable:$true] %s152_s5 }
   0x8   :  { %v30_v10 = vld [vmem:[#allocation2] sm:$0xff]  ;;  %s201_s0 = scalar_lea.vmem %s153_s5, 128  ;;  %p206_p1 = scmp.lt.s32.totalorder %s153_s5, %s153_s5 }
   0x9   :  { %v169_v14 = vld [vmem:[%s293_s2] ss:$0 sm:$0xff]  ;;  %p202_p0 = scmp.ne.s32.totalorder %s153_s5, %s201_s0  ;;  %p207_p2 = scmp.lt.s32.totalorder %s201_s0, %s201_s0 }
   0xa   :  { %184 = vmatpush3.xpose.msk.msra.mxu0 %vm31_vm0, %v27_v3 }
   0xb   :  { %185 = vmatprep.subr.mxu0 %v223_v1  ;;  %p208_p3 = por %p207_p2, %p206_p1 }
   0xd   :  { %p209_p4 = pnand %p208_p3, %p202_p0 }
   0xe   :  { %186 = vmatpush3.xpose.msk.msra.mxu0 %vm31_vm0, %v26_v4 }
   0xf   :  { %187 = vmatprep.subr.mxu0 %v223_v1 }
  0x12   :  { %188 = vmatpush3.xpose.msk.msra.mxu0 %vm31_vm0, %v25_v5 }
  0x13   :  { %189 = vmatprep.subr.mxu0 %v223_v1 }
  0x16   :  { %190 = vmatpush3.xpose.msk.msra.mxu0 %vm31_vm0, %v24_v6 }
  0x17   :  { %191 = vmatprep.subr.mxu0 %v223_v1 }
  0x1a   :  { %192 = vmatpush3.xpose.msk.msra.mxu0 %vm31_vm0, %v23_v7 }
  0x1b   :  { %193 = vmatprep.subr.mxu0 %v223_v1 }
  0x1e   :  { %194 = vmatpush3.xpose.msk.msra.mxu0 %vm31_vm0, %v22_v8 }
  0x21   :  { %196 = vmatmul.mubr.msk.f32.vlgmr.msra.gmra.mxu0 %vm31_vm0, %v21_v9 }
  0xe1   :  { %v125_v11 = vpop.f32.mrf.mxu0 }
  0xe2   :  { %v129_v12 = vadd.f32 %v125_v11, %v30_v10 }
  0xe3   :  { %v197_v13 = vpop.f32.mrf.mxu0 }
  0xe4   :  { %131 = vst.msk [vmem:[#allocation2] sm:$0xff] %vm19_vm2, %v129_v12 }
  0xeb   :  { %v135_v15 = vld [vmem:[#allocation2] sm:$0xff] }
  0xec   :  { %v143_v16 = vadd.f32 %v169_v14, %v135_v15 }
  0xee   :  { %v144_v17 = vmax.f32 %v143_v16, 0.0 }
  0xf0   :  { %145 = vst.msk [vmem:[#allocation3] sm:$0xff] %vm19_vm2, %v144_v17 }
  0xf1   :  { %212 = shalt.err (!%p209_p4)
}
  0xf2   :  { %155 = dma.vmem_to_hbm [thread:$0]  %s153_s5, 128, %s294_s3, [#allocation4]  }
  0xf3   :  { %221 = dma.done.wait [#allocation4], 128  }
  0xf4   :  { %222 = vsyncadd [#allocation4], 4294967168 }
  0xf5   :  { %159 = vsyncpa [#allocation4], 1 }

</bundles_post_ra>
